<compile_context>
chip_gen: v7x
topology: tpu7x:2x2x1
jax: 0.10.0
libtpu: 0.0.40
codegen_flags: <defaults>
</compile_context>

<pallas_src>
import jax
import jax.numpy as jnp
from jax.experimental import pallas as pl
from jax.experimental.pallas import tpu as pltpu


# ---------------------------------------------------------------------------
# Fused decoder-step kernel
# ---------------------------------------------------------------------------
def _make_decoder_step_kernel(num_layers, hidden_size):
    H = hidden_size

    def kernel(*refs):
        # inputs
        x_ref = refs[0]                                   # SMEM (N,) int32 token ids
        emb_ref = refs[1]                                 # VMEM (vocab, E) f32
        w_refs = refs[2:2 + num_layers]                   # VMEM (in_dim_l + H, 4H) bf16
        b_refs = refs[2 + num_layers:2 + 2 * num_layers]  # VMEM (1, 4H) f32
        base = 2 + 2 * num_layers
        h_ref, c_ref, wfc_ref, bfc_ref = refs[base:base + 4]
        # outputs
        pred_ref, h_out_ref, c_out_ref = refs[base + 4:base + 7]
        # scratch
        emb_scratch = refs[base + 7]                      # VMEM (N, E) f32

        n = emb_scratch.shape[0]

        # ---- embedding lookup: gather token rows from the VMEM table ----
        for i in range(n):                                # N is small & static -> unrolled
            tok = x_ref[i]
            emb_scratch[pl.ds(i, 1), :] = emb_ref[pl.ds(tok, 1), :]
        layer_in = emb_scratch[...]                       # (N, E) f32
        # TODO(synk): nn.Dropout(p) is identity here (eval mode); no in-kernel RNG dropout.

        # ---- stacked LSTM cells (single time step) ----
        for layer in range(num_layers):
            h_prev = h_ref[layer]                         # (N, H) f32
            c_prev = c_ref[layer]                         # (N, H) f32
            # merged input+recurrent matmul: bf16 MXU operands, f32 accumulation
            xh = jnp.concatenate([layer_in, h_prev], axis=-1).astype(jnp.bfloat16)
            gates = (jnp.dot(xh, w_refs[layer][...],
                             preferred_element_type=jnp.float32)
                     + b_refs[layer][...])                # (N, 4H) f32
            # one sigmoid + one tanh over the whole gate tile (EUP), then slice
            sig = jax.nn.sigmoid(gates)
            th = jnp.tanh(gates)
            i_g = sig[:, 0 * H:1 * H]
            f_g = sig[:, 1 * H:2 * H]
            g_g = th[:, 2 * H:3 * H]
            o_g = sig[:, 3 * H:4 * H]
            c_new = f_g * c_prev + i_g * g_g              # f32 elementwise (VPU)
            h_new = o_g * jnp.tanh(c_new)
            h_out_ref[layer] = h_new
            c_out_ref[layer] = c_new
            layer_in = h_new                              # inter-layer dropout: identity

        # ---- FC over the lane-dense (padded) vocab ----
        pred_ref[...] = (jnp.dot(layer_in.astype(jnp.bfloat16), wfc_ref[...],
                                 preferred_element_type=jnp.float32)
                         + bfc_ref[...])

    return kernel


def decoder_step(x, embedding, w_cat, bias, hidden, cell, w_fc_t, b_fc):
    """x: int32 (N,); hidden/cell: (L, N, H). Returns (preds_padded, new_h, new_c)."""
    num_layers, n, h = hidden.shape
    v_pad = w_fc_t.shape[1]

    kernel = _make_decoder_step_kernel(num_layers, h)

    n_inputs = 2 + 2 * num_layers + 4
    hidden_idx = 2 + 2 * num_layers
    cell_idx = hidden_idx + 1

    vmem = pl.BlockSpec(memory_space=pltpu.MemorySpace.VMEM)
    smem = pl.BlockSpec(memory_space=pltpu.MemorySpace.SMEM)

    return pl.pallas_call(
        kernel,
        out_shape=(
            jax.ShapeDtypeStruct((n, v_pad), jnp.float32),                # padded logits
            jax.ShapeDtypeStruct((num_layers, n, h), jnp.float32),        # new hidden
            jax.ShapeDtypeStruct((num_layers, n, h), jnp.float32),        # new cell
        ),
        in_specs=[smem] + [vmem] * (n_inputs - 1),
        out_specs=(vmem, vmem, vmem),
        scratch_shapes=[pltpu.VMEM((n, embedding.shape[1]), jnp.float32)],
        # In-place state update: new hidden/cell reuse the incoming state buffers.
        input_output_aliases={hidden_idx: 1, cell_idx: 2},
    )(x, embedding, *w_cat, *bias, hidden, cell, w_fc_t, b_fc)


# ---------------------------------------------------------------------------
# Decoder module (params + forward), mirroring the PyTorch Decoder
# ---------------------------------------------------------------------------
class Decoder:
    def __init__(self, input_size, embedding_size, hidden_size, output_size,
                 num_layers, p, key):
        self.hidden_size = hidden_size
        self.num_layers = num_layers
        self.output_size = output_size
        self.p = p  # TODO(synk): dropout is identity here (eval mode).

        ks = jax.random.split(key, 1 + 4 * num_layers + 2)
        k_iter = iter(ks)
        scale = 1.0 / (hidden_size ** 0.5)

        # Embedding table (vocab, E), f32, gathered in-kernel.
        self.embedding = jax.random.normal(
            next(k_iter), (input_size, embedding_size), jnp.float32) * 0.1

        # Per-layer LSTM params, merged [W_ih^T ; W_hh^T] and fused bias.
        self.w_cat, self.bias = [], []
        for layer in range(num_layers):
            in_dim = embedding_size if layer == 0 else hidden_size
            w_ih = jax.random.uniform(next(k_iter), (4 * hidden_size, in_dim),
                                      jnp.float32, -scale, scale)
            w_hh = jax.random.uniform(next(k_iter), (4 * hidden_size, hidden_size),
                                      jnp.float32, -scale, scale)
            b_ih = jax.random.uniform(next(k_iter), (4 * hidden_size,),
                                      jnp.float32, -scale, scale)
            b_hh = jax.random.uniform(next(k_iter), (4 * hidden_size,),
                                      jnp.float32, -scale, scale)
            self.w_cat.append(
                jnp.concatenate([w_ih.T, w_hh.T], axis=0).astype(jnp.bfloat16))
            self.bias.append((b_ih + b_hh)[None, :])          # (1, 4H) f32

        # FC: Linear(hidden_size, output_size), padded to a lane-dense vocab.
        fc_scale = 1.0 / (hidden_size ** 0.5)
        w_fc = jax.random.uniform(next(k_iter), (output_size, hidden_size),
                                  jnp.float32, -fc_scale, fc_scale)
        b_fc = jax.random.uniform(next(k_iter), (output_size,),
                                  jnp.float32, -fc_scale, fc_scale)
        v_pad = ((output_size + 127) // 128) * 128
        w_fc_t = jnp.zeros((hidden_size, v_pad), jnp.float32).at[:, :output_size].set(w_fc.T)
        b_fc_p = jnp.zeros((1, v_pad), jnp.float32).at[:, :output_size].set(b_fc)
        self.w_fc_t = w_fc_t.astype(jnp.bfloat16)             # (H, V_pad) bf16
        self.b_fc = b_fc_p                                    # (1, V_pad) f32

    def forward(self, x, hidden, cell):
        """x: int32 (N,); hidden, cell: (num_layers, N, H)."""
        preds_pad, new_h, new_c = decoder_step(
            x, self.embedding, self.w_cat, self.bias, hidden, cell,
            self.w_fc_t, self.b_fc)
        return preds_pad[:, :self.output_size], new_h, new_c


# ---------------------------------------------------------------------------
# Pure-JAX reference (same bf16-operand / f32-accumulate math) for sanity check
# ---------------------------------------------------------------------------
def _ref_forward(dec, x, hidden, cell):
    H = dec.hidden_size
    emb = jnp.take(dec.embedding, x, axis=0)                  # (N, E) f32
    layer_in = emb
    hs, cs = [], []
    for layer in range(dec.num_layers):
        xh = jnp.concatenate([layer_in, hidden[layer]], axis=-1).astype(jnp.bfloat16)
        gates = (jnp.dot(xh, dec.w_cat[layer], preferred_element_type=jnp.float32)
                 + dec.bias[layer])
        i = jax.nn.sigmoid(gates[:, 0 * H:1 * H])
        f = jax.nn.sigmoid(gates[:, 1 * H:2 * H])
        g = jnp.tanh(gates[:, 2 * H:3 * H])
        o = jax.nn.sigmoid(gates[:, 3 * H:4 * H])
        c_new = f * cell[layer] + i * g
        h_new = o * jnp.tanh(c_new)
        hs.append(h_new)
        cs.append(c_new)
        layer_in = h_new
    preds = (jnp.dot(layer_in.astype(jnp.bfloat16), dec.w_fc_t,
                     preferred_element_type=jnp.float32) + dec.b_fc)
    return preds[:, :dec.output_size], jnp.stack(hs, 0), jnp.stack(cs, 0)


if __name__ == "__main__":
    # Small, deterministic config consistent with the module's forward.
    input_size = 50        # decoder-side vocab (embedding rows)
    embedding_size = 32
    hidden_size = 32
    output_size = 64       # len(english.vocab) stand-in
    num_layers = 2
    p = 0.0
    batch = 8

    key = jax.random.PRNGKey(0)
    k_params, k_x, k_h, k_c = jax.random.split(key, 4)

    decoder = Decoder(input_size, embedding_size, hidden_size, output_size,
                      num_layers, p, k_params)

    x = jax.random.randint(k_x, (batch,), 0, input_size, dtype=jnp.int32)
    hidden = jax.random.normal(k_h, (num_layers, batch, hidden_size), jnp.float32)
    cell = jax.random.normal(k_c, (num_layers, batch, hidden_size), jnp.float32)

    # Compute the reference first (the kernel aliases the state buffers in place).
    r_preds, r_hidden, r_cell = _ref_forward(decoder, x, hidden, cell)
    jax.block_until_ready((r_preds, r_hidden, r_cell))

    preds, new_hidden, new_cell = decoder.forward(x, hidden, cell)
    jax.block_until_ready((preds, new_hidden, new_cell))

    assert preds.shape == (batch, output_size)
    assert new_hidden.shape == (num_layers, batch, hidden_size)
    assert new_cell.shape == (num_layers, batch, hidden_size)
    # bf16 MXU operands -> slightly looser tolerance than pure-f32.
    assert jnp.allclose(preds, r_preds, atol=2e-2, rtol=2e-2)
    assert jnp.allclose(new_hidden, r_hidden, atol=2e-2, rtol=2e-2)
    assert jnp.allclose(new_cell, r_cell, atol=2e-2, rtol=2e-2)

    print("KERNEL_OK")
</pallas_src>

<mosaic_0001>
module attributes {stable_mosaic.version = 11 : i64} {
  func.func @kernel(%arg0: memref<8xi32, #tpu.memory_space<smem>>, %arg1: memref<50x32xf32, #tpu.memory_space<vmem>>, %arg2: memref<64x128xbf16, #tpu.memory_space<vmem>>, %arg3: memref<64x128xbf16, #tpu.memory_space<vmem>>, %arg4: memref<1x128xf32, #tpu.memory_space<vmem>>, %arg5: memref<1x128xf32, #tpu.memory_space<vmem>>, %arg6: memref<2x8x32xf32, #tpu.memory_space<vmem>>, %arg7: memref<2x8x32xf32, #tpu.memory_space<vmem>>, %arg8: memref<32x128xbf16, #tpu.memory_space<vmem>>, %arg9: memref<1x128xf32, #tpu.memory_space<vmem>>, %arg10: memref<8x128xf32, #tpu.memory_space<vmem>>, %arg11: memref<2x8x32xf32, #tpu.memory_space<vmem>>, %arg12: memref<2x8x32xf32, #tpu.memory_space<vmem>>, %arg13: memref<8x32xf32, #tpu.memory_space<vmem>>) attributes {dimension_semantics = [], scalar_prefetch = 0 : i64, scratch_operands = 1 : i64, tpu.core_type = #tpu.core_type<tc>} {
    %c0 = arith.constant 0 : index
    %0 = memref.load %arg0[%c0] : memref<8xi32, #tpu.memory_space<smem>>
    %1 = arith.index_cast %0 : i32 to index
    %c0_0 = arith.constant 0 : index
    %2 = vector.load %arg1[%1, %c0_0] : memref<50x32xf32, #tpu.memory_space<vmem>>, vector<1x32xf32>
    %c0_1 = arith.constant 0 : index
    %c0_2 = arith.constant 0 : index
    %3 = vector.load %arg13[%c0_1, %c0_2] : memref<8x32xf32, #tpu.memory_space<vmem>>, vector<1x32xf32>
    tpu.vector_store %arg13[%c0_1, %c0_2], %2 {strides = array<i32>} : memref<8x32xf32, #tpu.memory_space<vmem>>, vector<1x32xf32>,
    %c1 = arith.constant 1 : index
    %4 = memref.load %arg0[%c1] : memref<8xi32, #tpu.memory_space<smem>>
    %5 = arith.index_cast %4 : i32 to index
    %c0_3 = arith.constant 0 : index
    %6 = vector.load %arg1[%5, %c0_3] : memref<50x32xf32, #tpu.memory_space<vmem>>, vector<1x32xf32>
    %c1_4 = arith.constant 1 : index
    %c0_5 = arith.constant 0 : index
    %7 = vector.load %arg13[%c1_4, %c0_5] : memref<8x32xf32, #tpu.memory_space<vmem>>, vector<1x32xf32>
    tpu.vector_store %arg13[%c1_4, %c0_5], %6 {strides = array<i32>} : memref<8x32xf32, #tpu.memory_space<vmem>>, vector<1x32xf32>,
    %c2 = arith.constant 2 : index
    %8 = memref.load %arg0[%c2] : memref<8xi32, #tpu.memory_space<smem>>
    %9 = arith.index_cast %8 : i32 to index
    %c0_6 = arith.constant 0 : index
    %10 = vector.load %arg1[%9, %c0_6] : memref<50x32xf32, #tpu.memory_space<vmem>>, vector<1x32xf32>
    %c2_7 = arith.constant 2 : index
    %c0_8 = arith.constant 0 : index
    %11 = vector.load %arg13[%c2_7, %c0_8] : memref<8x32xf32, #tpu.memory_space<vmem>>, vector<1x32xf32>
    tpu.vector_store %arg13[%c2_7, %c0_8], %10 {strides = array<i32>} : memref<8x32xf32, #tpu.memory_space<vmem>>, vector<1x32xf32>,
    %c3 = arith.constant 3 : index
    %12 = memref.load %arg0[%c3] : memref<8xi32, #tpu.memory_space<smem>>
    %13 = arith.index_cast %12 : i32 to index
    %c0_9 = arith.constant 0 : index
    %14 = vector.load %arg1[%13, %c0_9] : memref<50x32xf32, #tpu.memory_space<vmem>>, vector<1x32xf32>
    %c3_10 = arith.constant 3 : index
    %c0_11 = arith.constant 0 : index
    %15 = vector.load %arg13[%c3_10, %c0_11] : memref<8x32xf32, #tpu.memory_space<vmem>>, vector<1x32xf32>
    tpu.vector_store %arg13[%c3_10, %c0_11], %14 {strides = array<i32>} : memref<8x32xf32, #tpu.memory_space<vmem>>, vector<1x32xf32>,
    %c4 = arith.constant 4 : index
    %16 = memref.load %arg0[%c4] : memref<8xi32, #tpu.memory_space<smem>>
    %17 = arith.index_cast %16 : i32 to index
    %c0_12 = arith.constant 0 : index
    %18 = vector.load %arg1[%17, %c0_12] : memref<50x32xf32, #tpu.memory_space<vmem>>, vector<1x32xf32>
    %c4_13 = arith.constant 4 : index
    %c0_14 = arith.constant 0 : index
    %19 = vector.load %arg13[%c4_13, %c0_14] : memref<8x32xf32, #tpu.memory_space<vmem>>, vector<1x32xf32>
    tpu.vector_store %arg13[%c4_13, %c0_14], %18 {strides = array<i32>} : memref<8x32xf32, #tpu.memory_space<vmem>>, vector<1x32xf32>,
    %c5 = arith.constant 5 : index
    %20 = memref.load %arg0[%c5] : memref<8xi32, #tpu.memory_space<smem>>
    %21 = arith.index_cast %20 : i32 to index
    %c0_15 = arith.constant 0 : index
    %22 = vector.load %arg1[%21, %c0_15] : memref<50x32xf32, #tpu.memory_space<vmem>>, vector<1x32xf32>
    %c5_16 = arith.constant 5 : index
    %c0_17 = arith.constant 0 : index
    %23 = vector.load %arg13[%c5_16, %c0_17] : memref<8x32xf32, #tpu.memory_space<vmem>>, vector<1x32xf32>
    tpu.vector_store %arg13[%c5_16, %c0_17], %22 {strides = array<i32>} : memref<8x32xf32, #tpu.memory_space<vmem>>, vector<1x32xf32>,
    %c6 = arith.constant 6 : index
    %24 = memref.load %arg0[%c6] : memref<8xi32, #tpu.memory_space<smem>>
    %25 = arith.index_cast %24 : i32 to index
    %c0_18 = arith.constant 0 : index
    %26 = vector.load %arg1[%25, %c0_18] : memref<50x32xf32, #tpu.memory_space<vmem>>, vector<1x32xf32>
    %c6_19 = arith.constant 6 : index
    %c0_20 = arith.constant 0 : index
    %27 = vector.load %arg13[%c6_19, %c0_20] : memref<8x32xf32, #tpu.memory_space<vmem>>, vector<1x32xf32>
    tpu.vector_store %arg13[%c6_19, %c0_20], %26 {strides = array<i32>} : memref<8x32xf32, #tpu.memory_space<vmem>>, vector<1x32xf32>,
    %c7 = arith.constant 7 : index
    %28 = memref.load %arg0[%c7] : memref<8xi32, #tpu.memory_space<smem>>
    %29 = arith.index_cast %28 : i32 to index
    %c0_21 = arith.constant 0 : index
    %30 = vector.load %arg1[%29, %c0_21] : memref<50x32xf32, #tpu.memory_space<vmem>>, vector<1x32xf32>
    %c7_22 = arith.constant 7 : index
    %c0_23 = arith.constant 0 : index
    %31 = vector.load %arg13[%c7_22, %c0_23] : memref<8x32xf32, #tpu.memory_space<vmem>>, vector<1x32xf32>
    tpu.vector_store %arg13[%c7_22, %c0_23], %30 {strides = array<i32>} : memref<8x32xf32, #tpu.memory_space<vmem>>, vector<1x32xf32>,
    %c0_24 = arith.constant 0 : index
    %c0_25 = arith.constant 0 : index
    %32 = vector.load %arg13[%c0_24, %c0_25] : memref<8x32xf32, #tpu.memory_space<vmem>>, vector<8x32xf32>
    %c0_26 = arith.constant 0 : index
    %c0_27 = arith.constant 0 : index
    %c0_28 = arith.constant 0 : index
    %33 = vector.load %arg6[%c0_26, %c0_27, %c0_28] : memref<2x8x32xf32, #tpu.memory_space<vmem>>, vector<1x8x32xf32>
    %34 = vector.shape_cast %33 : vector<1x8x32xf32> to vector<8x32xf32>
    %c0_29 = arith.constant 0 : index
    %c0_30 = arith.constant 0 : index
    %c0_31 = arith.constant 0 : index
    %35 = vector.load %arg7[%c0_29, %c0_30, %c0_31] : memref<2x8x32xf32, #tpu.memory_space<vmem>>, vector<1x8x32xf32>
    %36 = vector.shape_cast %35 : vector<1x8x32xf32> to vector<8x32xf32>
    %37 = tpu.concatenate %32, %34 in 1 : vector<8x32xf32>, vector<8x32xf32> -> vector<8x64xf32>
    %38 = arith.truncf %37 : vector<8x64xf32> to vector<8x64xbf16>
    %c0_32 = arith.constant 0 : index
    %c0_33 = arith.constant 0 : index
    %39 = vector.load %arg2[%c0_32, %c0_33] : memref<64x128xbf16, #tpu.memory_space<vmem>>, vector<64x128xbf16>
    %cst = arith.constant dense<0.000000e+00> : vector<8x128xf32>
    %40 = tpu.matmul %38, %39, %cst {dimension_numbers = #tpu.dot_dimension_numbers<[1], [0], [0], [1], [0, 0, 1, 1], [], []>} : vector<8x64xbf16>, vector<64x128xbf16>, vector<8x128xf32> -> vector<8x128xf32>
    %c0_34 = arith.constant 0 : index
    %c0_35 = arith.constant 0 : index
    %41 = vector.load %arg4[%c0_34, %c0_35] : memref<1x128xf32, #tpu.memory_space<vmem>>, vector<1x128xf32>
    %42 = vector.broadcast %41 : vector<1x128xf32> to vector<8x128xf32>
    %43 = arith.addf %40, %42 : vector<8x128xf32>
    %44 = arith.negf %43 : vector<8x128xf32>
    %45 = math.exp %44 : vector<8x128xf32>
    %cst_36 = arith.constant 1.000000e+00 : f32
    %46 = vector.broadcast %cst_36 : f32 to vector<8x128xf32>
    %47 = arith.addf %46, %45 : vector<8x128xf32>
    %48 = arith.divf %46, %47 : vector<8x128xf32>
    %49 = math.tanh %43 : vector<8x128xf32>
    %50 = vector.extract_strided_slice %48 {offsets = [0, 0], sizes = [8, 32], strides = [1, 1]} : vector<8x128xf32> to vector<8x32xf32>
    %51 = vector.extract_strided_slice %48 {offsets = [0, 32], sizes = [8, 32], strides = [1, 1]} : vector<8x128xf32> to vector<8x32xf32>
    %52 = vector.extract_strided_slice %49 {offsets = [0, 64], sizes = [8, 32], strides = [1, 1]} : vector<8x128xf32> to vector<8x32xf32>
    %53 = vector.extract_strided_slice %48 {offsets = [0, 96], sizes = [8, 32], strides = [1, 1]} : vector<8x128xf32> to vector<8x32xf32>
    %54 = arith.mulf %51, %36 : vector<8x32xf32>
    %55 = arith.mulf %50, %52 : vector<8x32xf32>
    %56 = arith.addf %54, %55 : vector<8x32xf32>
    %57 = math.tanh %56 : vector<8x32xf32>
    %58 = arith.mulf %53, %57 : vector<8x32xf32>
    %c0_37 = arith.constant 0 : index
    %c0_38 = arith.constant 0 : index
    %c0_39 = arith.constant 0 : index
    %59 = vector.load %arg11[%c0_37, %c0_38, %c0_39] : memref<2x8x32xf32, #tpu.memory_space<vmem>>, vector<1x8x32xf32>
    %60 = vector.shape_cast %59 : vector<1x8x32xf32> to vector<8x32xf32>
    %61 = vector.shape_cast %58 : vector<8x32xf32> to vector<1x8x32xf32>
    tpu.vector_store %arg11[%c0_37, %c0_38, %c0_39], %61 {strides = array<i32>} : memref<2x8x32xf32, #tpu.memory_space<vmem>>, vector<1x8x32xf32>,
    %c0_40 = arith.constant 0 : index
    %c0_41 = arith.constant 0 : index
    %c0_42 = arith.constant 0 : index
    %62 = vector.load %arg12[%c0_40, %c0_41, %c0_42] : memref<2x8x32xf32, #tpu.memory_space<vmem>>, vector<1x8x32xf32>
    %63 = vector.shape_cast %62 : vector<1x8x32xf32> to vector<8x32xf32>
    %64 = vector.shape_cast %56 : vector<8x32xf32> to vector<1x8x32xf32>
    tpu.vector_store %arg12[%c0_40, %c0_41, %c0_42], %64 {strides = array<i32>} : memref<2x8x32xf32, #tpu.memory_space<vmem>>, vector<1x8x32xf32>,
    %c1_43 = arith.constant 1 : index
    %c0_44 = arith.constant 0 : index
    %c0_45 = arith.constant 0 : index
    %65 = vector.load %arg6[%c1_43, %c0_44, %c0_45] : memref<2x8x32xf32, #tpu.memory_space<vmem>>, vector<1x8x32xf32>
    %66 = vector.shape_cast %65 : vector<1x8x32xf32> to vector<8x32xf32>
    %c1_46 = arith.constant 1 : index
    %c0_47 = arith.constant 0 : index
    %c0_48 = arith.constant 0 : index
    %67 = vector.load %arg7[%c1_46, %c0_47, %c0_48] : memref<2x8x32xf32, #tpu.memory_space<vmem>>, vector<1x8x32xf32>
    %68 = vector.shape_cast %67 : vector<1x8x32xf32> to vector<8x32xf32>
    %69 = tpu.concatenate %58, %66 in 1 : vector<8x32xf32>, vector<8x32xf32> -> vector<8x64xf32>
    %70 = arith.truncf %69 : vector<8x64xf32> to vector<8x64xbf16>
    %c0_49 = arith.constant 0 : index
    %c0_50 = arith.constant 0 : index
    %71 = vector.load %arg3[%c0_49, %c0_50] : memref<64x128xbf16, #tpu.memory_space<vmem>>, vector<64x128xbf16>
    %cst_51 = arith.constant dense<0.000000e+00> : vector<8x128xf32>
    %72 = tpu.matmul %70, %71, %cst_51 {dimension_numbers = #tpu.dot_dimension_numbers<[1], [0], [0], [1], [0, 0, 1, 1], [], []>} : vector<8x64xbf16>, vector<64x128xbf16>, vector<8x128xf32> -> vector<8x128xf32>
    %c0_52 = arith.constant 0 : index
    %c0_53 = arith.constant 0 : index
    %73 = vector.load %arg5[%c0_52, %c0_53] : memref<1x128xf32, #tpu.memory_space<vmem>>, vector<1x128xf32>
    %74 = vector.broadcast %73 : vector<1x128xf32> to vector<8x128xf32>
    %75 = arith.addf %72, %74 : vector<8x128xf32>
    %76 = arith.negf %75 : vector<8x128xf32>
    %77 = math.exp %76 : vector<8x128xf32>
    %cst_54 = arith.constant 1.000000e+00 : f32
    %78 = vector.broadcast %cst_54 : f32 to vector<8x128xf32>
    %79 = arith.addf %78, %77 : vector<8x128xf32>
    %80 = arith.divf %78, %79 : vector<8x128xf32>
    %81 = math.tanh %75 : vector<8x128xf32>
    %82 = vector.extract_strided_slice %80 {offsets = [0, 0], sizes = [8, 32], strides = [1, 1]} : vector<8x128xf32> to vector<8x32xf32>
    %83 = vector.extract_strided_slice %80 {offsets = [0, 32], sizes = [8, 32], strides = [1, 1]} : vector<8x128xf32> to vector<8x32xf32>
    %84 = vector.extract_strided_slice %81 {offsets = [0, 64], sizes = [8, 32], strides = [1, 1]} : vector<8x128xf32> to vector<8x32xf32>
    %85 = vector.extract_strided_slice %80 {offsets = [0, 96], sizes = [8, 32], strides = [1, 1]} : vector<8x128xf32> to vector<8x32xf32>
    %86 = arith.mulf %83, %68 : vector<8x32xf32>
    %87 = arith.mulf %82, %84 : vector<8x32xf32>
    %88 = arith.addf %86, %87 : vector<8x32xf32>
    %89 = math.tanh %88 : vector<8x32xf32>
    %90 = arith.mulf %85, %89 : vector<8x32xf32>
    %c1_55 = arith.constant 1 : index
    %c0_56 = arith.constant 0 : index
    %c0_57 = arith.constant 0 : index
    %91 = vector.load %arg11[%c1_55, %c0_56, %c0_57] : memref<2x8x32xf32, #tpu.memory_space<vmem>>, vector<1x8x32xf32>
    %92 = vector.shape_cast %91 : vector<1x8x32xf32> to vector<8x32xf32>
    %93 = vector.shape_cast %90 : vector<8x32xf32> to vector<1x8x32xf32>
    tpu.vector_store %arg11[%c1_55, %c0_56, %c0_57], %93 {strides = array<i32>} : memref<2x8x32xf32, #tpu.memory_space<vmem>>, vector<1x8x32xf32>,
    %c1_58 = arith.constant 1 : index
    %c0_59 = arith.constant 0 : index
    %c0_60 = arith.constant 0 : index
    %94 = vector.load %arg12[%c1_58, %c0_59, %c0_60] : memref<2x8x32xf32, #tpu.memory_space<vmem>>, vector<1x8x32xf32>
    %95 = vector.shape_cast %94 : vector<1x8x32xf32> to vector<8x32xf32>
    %96 = vector.shape_cast %88 : vector<8x32xf32> to vector<1x8x32xf32>
    tpu.vector_store %arg12[%c1_58, %c0_59, %c0_60], %96 {strides = array<i32>} : memref<2x8x32xf32, #tpu.memory_space<vmem>>, vector<1x8x32xf32>,
    %97 = arith.truncf %90 : vector<8x32xf32> to vector<8x32xbf16>
    %c0_61 = arith.constant 0 : index
    %c0_62 = arith.constant 0 : index
    %98 = vector.load %arg8[%c0_61, %c0_62] : memref<32x128xbf16, #tpu.memory_space<vmem>>, vector<32x128xbf16>
    %cst_63 = arith.constant dense<0.000000e+00> : vector<8x128xf32>
    %99 = tpu.matmul %97, %98, %cst_63 {dimension_numbers = #tpu.dot_dimension_numbers<[1], [0], [0], [1], [0, 0, 1, 1], [], []>} : vector<8x32xbf16>, vector<32x128xbf16>, vector<8x128xf32> -> vector<8x128xf32>
    %c0_64 = arith.constant 0 : index
    %c0_65 = arith.constant 0 : index
    %100 = vector.load %arg9[%c0_64, %c0_65] : memref<1x128xf32, #tpu.memory_space<vmem>>, vector<1x128xf32>
    %101 = vector.broadcast %100 : vector<1x128xf32> to vector<8x128xf32>
    %102 = arith.addf %99, %101 : vector<8x128xf32>
    %c0_66 = arith.constant 0 : index
    %c0_67 = arith.constant 0 : index
    %103 = vector.load %arg10[%c0_66, %c0_67] : memref<8x128xf32, #tpu.memory_space<vmem>>, vector<8x128xf32>
    tpu.vector_store %arg10[%c0_66, %c0_67], %102 {strides = array<i32>} : memref<8x128xf32, #tpu.memory_space<vmem>>, vector<8x128xf32>,
    return
  }
}

</mosaic_0001>

<bundles_post_ra>
// kernel: tpu_custom_call.1
= control target key start
LH: loop header
LB: loop body
LE: loop exit
PB: predicated region body
PF: predicated region fallthrough
CT: control target
= control target key end

     0   :  { %18 = vsyncpa [#allocation6], 0  ;;  %s1024_s0 = inlined_call_operand.vmem [shape: s32[8], index: 0, kind: input, shape index: {}]   ;;  %s1025_s1 = inlined_call_operand.vmem [shape: f32[50,32], index: 1, kind: input, shape index: {}]   ;;  %s1026_s2 = inlined_call_operand.vmem [shape: bf16[64,128], index: 2, kind: input, shape index: {}]   ;;  %s1027_s3 = inlined_call_operand.vmem [shape: bf16[64,128], index: 3, kind: input, shape index: {}]   ;;  %s1028_s4 = inlined_call_operand.vmem [shape: f32[1,128], index: 4, kind: input, shape index: {}]   ;;  %s1029_s5 = inlined_call_operand.vmem [shape: f32[1,128], index: 5, kind: input, shape index: {}]   ;;  %s1030_s6 = inlined_call_operand.hbm [shape: f32[2,8,32], index: 6, kind: input, shape index: {}, may-alias: {6,11}]   ;;  %s1031_s7 = inlined_call_operand.hbm [shape: f32[2,8,32], index: 7, kind: input, shape index: {}, may-alias: {7,12}]   ;;  %s1032_s8 = inlined_call_operand.vmem [shape: bf16[32,128], index: 8, kind: input, shape index: {}]   ;;  %s1033_s9 = inlined_call_operand.vmem [shape: f32[1,128], index: 9, kind: input, shape index: {}]   ;;  %s1034_s10 = inlined_call_operand.hbm [shape: f32[8,128], index: 10, kind: output, shape index: {0}]   ;;  %s1035_s11 = inlined_call_operand.hbm [shape: f32[2,8,32], index: 11, kind: output, shape index: {1}, may-alias: {6,11}]   ;;  %s1036_s12 = inlined_call_operand.hbm [shape: f32[2,8,32], index: 12, kind: output, shape index: {2}, may-alias: {7,12}]  }
   0x1   :  { %19 = vsyncpa [#allocation4], 0 }
   0x2   :  { %20 = vsyncpa [#allocation9], 0 }
   0x3   :  { %21 = vsyncpa [#allocation5], 0 }
   0x4   :  { %22 = vsyncpa [#allocation12], 0  ;;  %s29_s23 = sshll.u32 %s1024_s0, 4  ;;  %s30_s23 = int_to_ptr.vmem [resolvable:$true] %s29_s23 }
   0x5   :  { %s614_s24 = scalar_lea.vmem %s30_s23, 16  ;;  %p619_p1 = scmp.lt.s32.totalorder %s30_s23, %s30_s23 }
   0x6   :  { %p615_p0 = scmp.ne.s32.totalorder %s30_s23, %s614_s24  ;;  %p620_p2 = scmp.lt.s32.totalorder %s614_s24, %s614_s24 }
   0x8   :  { %p621_p3 = por %p620_p2, %p619_p1 }
   0xa   :  { %p622_p4 = pnand %p621_p3, %p615_p0 }
   0xc   :  { %625 = shalt.err (!%p622_p4)
}
   0xd   :  { %s746_s25 = smov [#allocation3]   ;;  %s747_s26 = smov [#allocation7]  }
   0xe   :  { %32 = dma.vmem_to_smem %s30_s23, 16, %s746_s25, [#allocation6]  }
   0xf   :  { %s48_s27 = sshll.u32 %s747_s26, 4  ;;  %s626_s30 = scalar_lea.hbm %s1030_s6, 256  ;;  %s49_s27 = int_to_ptr.vmem [resolvable:$true] %s48_s27 }
  0x10   :  { %p627_p5 = scmp.ne.s32.totalorder %s1030_s6, %s626_s30  ;;  %p630_p6 = scmp.lt.u32.totalorder %s626_s30, %s1030_s6 }
  0x12   :  { %p632_p7 = pnand %p630_p6, %p627_p5 }
  0x14   :  { %635 = shalt.err (!%p632_p7)
}
  0x15   :  { %s636_s16 = scalar_lea.vmem %s49_s27, 256  ;;  %p641_p9 = scmp.lt.s32.totalorder %s49_s27, %s49_s27 }
  0x16   :  { %p637_p8 = scmp.ne.s32.totalorder %s49_s27, %s636_s16  ;;  %p642_p10 = scmp.lt.s32.totalorder %s636_s16, %s636_s16 }
  0x18   :  { %p643_p11 = por %p642_p10, %p641_p9 }
  0x1a   :  { %p644_p12 = pnand %p643_p11, %p637_p8 }
  0x1c   :  { %647 = shalt.err (!%p644_p12)
}
  0x1d   :  { %s1037_s17 = smov 128   ;;  %s749_s18 = smov 8  }
  0x1e   :  { %54 = dma.hbm_to_vmem [thread:$0]  %s1030_s6, 256, %s49_s27, [#allocation4], %s1037_s17, %s1037_s17, %s749_s18  }
  0x1f   :  { %s750_s21 = smov [#allocation8]   ;;  %s648_s25 = scalar_lea.hbm %s1031_s7, 256 }
  0x20   :  { %s60_s22 = sshll.u32 %s750_s21, 4  ;;  %p649_p13 = scmp.ne.s32.totalorder %s1031_s7, %s648_s25  ;;  %s61_s22 = int_to_ptr.vmem [resolvable:$true] %s60_s22 }
  0x21   :  { %p652_p0 = scmp.lt.u32.totalorder %s648_s25, %s1031_s7 }
  0x23   :  { %p654_p1 = pnand %p652_p0, %p649_p13 }
  0x25   :  { %657 = shalt.err (!%p654_p1)
}
  0x26   :  { %s658_s13 = scalar_lea.vmem %s61_s22, 256  ;;  %p663_p3 = scmp.lt.s32.totalorder %s61_s22, %s61_s22 }
  0x27   :  { %p659_p2 = scmp.ne.s32.totalorder %s61_s22, %s658_s13  ;;  %p664_p4 = scmp.lt.s32.totalorder %s658_s13, %s658_s13 }
  0x29   :  { %p665_p5 = por %p664_p4, %p663_p3 }
  0x2b   :  { %p666_p6 = pnand %p665_p5, %p659_p2 }
  0x2d   :  { %669 = shalt.err (!%p666_p6)
}
  0x2e   :  { %66 = dma.hbm_to_vmem [thread:$0]  %s1031_s7, 256, %s61_s22, [#allocation9], %s1037_s17, %s1037_s17, %s749_s18  }
  0x2f   :  { %736 = dma.done.wait [#allocation6], 16  }
  0x30   :  { %737 = vsyncadd [#allocation6], 4294967280 }
  0x31   :  { %738 = dma.done.wait [#allocation4], 256  }
  0x32   :  { %739 = vsyncadd [#allocation4], 4294967040 }
  0x33   :  { %740 = dma.done.wait [#allocation9], 256  }
  0x34   :  { %741 = vsyncadd [#allocation9], 4294967040 }
  0x35   :  { %80 = sfence }
  0x36   :  { %v116_v0 = vld [vmem:[#allocation7] sm:$0xff]  ;;  %v588_v1 = vld [vmem:[%s1026_s2] sm:$0xff]   ;;  %s751_s15 = smov 32   ;;  %v752_v2 = vmov 0.0   ;;  %s82_s19 = sld [smem:[#allocation3]]  ;;  %v590_v4 = vld [vmem:[%s1026_s2 + $0x10] sm:$0xff]  }
  0x37   :  { %119 = vrot.lane.b32.xlu0 %v116_v0, %s751_s15  ;;  %543 = vmatprep.subr.bf16.mxu0 %v752_v2  ;;  %v589_v3 = vld [vmem:[%s1026_s2 + $0x8] sm:$0xff]   ;;  %s505_s20 = sld [smem:[#allocation3 + $0x1]]  ;;  %s506_s21 = sld [smem:[#allocation3 + $0x2]]  ;;  %vm85_vm0 = vcmask 253952   ;;  %vm753_vm1 = vmmov 0   ;;  %v117_v5 = vld [vmem:[#allocation8] sm:$0xff] }
  0x38   :  { %544 = vmatpush3.bf16.msra.mxu0 %v588_v1  ;;  %555 = vmatprep.subr.bf16.mxu1 %v752_v2  ;;  %s507_s22 = sld [smem:[#allocation3 + $0x3]]  ;;  %s867_s23 = sld [smem:[#allocation3 + $0x4]]  ;;  %v591_v6 = vld [vmem:[%s1026_s2 + $0x18] sm:$0xff]   ;;  %vm122_vm2 = vcmask 261120   ;;  %vm164_vm3 = vcmask 523264   ;;  %v592_v36 = vld [vmem:[%s1027_s3] sm:$0xff]  }
  0x39   :  { %545 = vmatprep.subr.bf16.mxu0 %v752_v2  ;;  %s869_s24 = sld [smem:[#allocation3 + $0x5]]  ;;  %s874_s28 = sld [smem:[#allocation3 + $0x6]]  ;;  %551 = vmatprep.mubr.msk.bf16.mxu0 %vm753_vm1, %v752_v2  ;;  %v512_v19 = vld [vmem:[%s1028_s4] ss:$0 sm:$0xff]  ;;  %v593_v37 = vld [vmem:[%s1027_s3 + $0x8] sm:$0xff]   ;;  %v594_v38 = vld [vmem:[%s1027_s3 + $0x10] sm:$0xff]  }
  0x3a   :  { %s876_s29 = sld [smem:[#allocation3 + $0x7]]  ;;  %216 = vrot.lane.b32.xlu1 %v117_v5, %s751_s15  ;;  %563 = vmatprep.mubr.msk.bf16.mxu1 %vm753_vm1, %v752_v2  ;;  %v247_v40 = vld [vmem:[#allocation7 + $0x8] sm:$0xff]  ;;  %v595_v41 = vld [vmem:[%s1027_s3 + $0x18] sm:$0xff]   ;;  %v249_v42 = vld [vmem:[#allocation8 + $0x8] sm:$0xff] }
  0x3b   :  { %556 = vmatpush3.bf16.msra.mxu1 %v592_v36  ;;  %v519_v49 = vld [vmem:[%s1029_s5] ss:$0 sm:$0xff] }
  0x3c   :  { %546 = vmatpush3.bf16.msra.mxu0 %v589_v3  ;;  %s83_s14 = scalar_lea.vmem %s1025_s1, %s82_s19  ;;  %557 = vmatprep.subr.bf16.mxu1 %v752_v2  ;;  %v596_v3 = vld [vmem:[%s1032_s8] sm:$0xff]  }
  0x3d   :  { %547 = vmatprep.subr.bf16.mxu0 %v752_v2  ;;  %s88_s16 = scalar_lea.vmem %s1025_s1, %s505_s20  ;;  %v84_v7 = vld [vmem:[%s83_s14] sm:$0x1]  ;;  %s92_s26 = scalar_lea.vmem %s1025_s1, %s506_s21 }
  0x3e   :  { %v89_v8 = vld [vmem:[%s88_s16] sm:$0x1]  ;;  %s96_s17 = scalar_lea.vmem %s1025_s1, %s507_s22  ;;  %86 = vst.msk [vmem:[#allocation2] sm:$0x1] %vm85_vm0, %v84_v7  ;;  %s100_s6 = scalar_lea.vmem %s1025_s1, %s867_s23 }
  0x3f   :  { %90 = vst.msk [vmem:[#allocation2 + $0x1] sm:$0x1] %vm85_vm0, %v89_v8  ;;  %v93_v9 = vld [vmem:[%s92_s26] sm:$0x1]  ;;  %s104_s21 = scalar_lea.vmem %s1025_s1, %s869_s24  ;;  %s108_s7 = scalar_lea.vmem %s1025_s1, %s874_s28  ;;  %558 = vmatpush3.bf16.msra.mxu1 %v593_v37 }
  0x40   :  { %548 = vmatpush3.bf16.msra.mxu0 %v590_v4  ;;  %v97_v10 = vld [vmem:[%s96_s17] sm:$0x1]  ;;  %94 = vst.msk [vmem:[#allocation2 + $0x2] sm:$0x1] %vm85_vm0, %v93_v9  ;;  %s112_s2 = scalar_lea.vmem %s1025_s1, %s876_s29  ;;  %s754_s24 = smov 64   ;;  %559 = vmatprep.subr.bf16.mxu1 %v752_v2  ;;  %v597_v4 = vld [vmem:[%s1032_s8 + $0x8] sm:$0xff]  }
  0x41   :  { %549 = vmatprep.subr.bf16.mxu0 %v752_v2  ;;  %98 = vst.msk [vmem:[#allocation2 + $0x3] sm:$0x1] %vm85_vm0, %v97_v10  ;;  %v101_v11 = vld [vmem:[%s100_s6] sm:$0x1]  ;;  %s756_s8 = smov [#allocation11]  }
  0x42   :  { %v105_v12 = vld [vmem:[%s104_s21] sm:$0x1]  ;;  %102 = vst.msk [vmem:[#allocation2 + $0x4] sm:$0x1] %vm85_vm0, %v101_v11  ;;  %s755_s21 = smov 96   ;;  %s464_s22 = sshll.u32 %s756_s8, 4  ;;  %s465_s22 = int_to_ptr.vmem [resolvable:$true] %s464_s22 }
  0x43   :  { %106 = vst.msk [vmem:[#allocation2 + $0x5] sm:$0x1] %vm85_vm0, %v105_v12  ;;  %v109_v13 = vld [vmem:[%s108_s7] sm:$0x1]  ;;  %560 = vmatpush3.bf16.msra.mxu1 %v594_v38  ;;  %p675_p8 = scmp.lt.s32.totalorder %s465_s22, %s465_s22 }
  0x44   :  { %v113_v14 = vld [vmem:[%s112_s2] sm:$0x1]  ;;  %110 = vst.msk [vmem:[#allocation2 + $0x6] sm:$0x1] %vm85_vm0, %v109_v13  ;;  %550 = vmatpush3.bf16.msra.mxu0 %v591_v6  ;;  %561 = vmatprep.subr.bf16.mxu1 %v752_v2 }
  0x45   :  { %114 = vst.msk [vmem:[#allocation2 + $0x7] sm:$0x1] %vm85_vm0, %v113_v14  ;;  %567 = vmatprep.subr.bf16.mxu0 %v752_v2 }
  0x47   :  { %562 = vmatpush3.bf16.msra.mxu1 %v595_v41 }
  0x4c   :  { %v115_v15 = vld [vmem:[#allocation2] sm:$0xff] }
  0xa9   :  { %v120_v16 = vpop.permute.xlu0 %119 }
  0xaa   :  { %v123_v17 = vsel %vm122_vm2, %v115_v15, %v120_v16 }
  0xab   :  { %v124_v18 = vpack.c.bf16 %v123_v17, %v123_v17 }
  0xac   :  { %v217_v32 = vpop.permute.xlu1 %216 }
  0xad   :  { %552 = vmatmul.mubr.msk.bf16.vlgmr.msra.gmra.mrb[0].mxu0 %vm164_vm3, %v124_v18 }
  0xae   :  { %571 = vmatprep.mubr.msk.bf16.mxu0 %vm753_vm1, %v752_v2  ;;  %568 = vmatpush3.bf16.msra.mxu0 %v596_v3 }
  0xaf   :  { %569 = vmatprep.subr.bf16.mxu0 %v752_v2 }
  0xb2   :  { %570 = vmatpush3.bf16.msra.mxu0 %v597_v4 }
 0x180   :  { %v202_v20 = vpop.f32.mrb[0].mxu0 }
 0x181   :  { %v203_v21 = vadd.f32 %v512_v19, %v202_v20  ;;  %v553_v22 = vpop.f32.mrb[1].mxu0 }
 0x182   :  { %v205_v23 = vpop.f32.mrb[2].mxu0 }
 0x183   :  { %598 = vtanh.f32 %v203_v21  ;;  %v554_v24 = vpop.f32.mrb[3].mxu0  ;;  %v518_v26 = vmul.f32 -1.442695, %v203_v21 }
 0x185   :  { %600 = vpow2.f32 %v518_v26 }
 0x18d   :  { %v599_v25 = vpop.eup %598 }
 0x18e   :  { %221 = vrot.lane.b32.xlu0 %v599_v25, %s754_s24 }
 0x18f   :  { %v601_v27 = vpop.eup %600 }
 0x190   :  { %v211_v28 = vadd.f32 1.0, %v601_v27 }
 0x192   :  { %602 = vrcp.f32 %v211_v28 }
 0x19c   :  { %v603_v29 = vpop.eup %602 }
 0x19d   :  { %v219_v33 = vmul.f32 %v603_v29, %v217_v32 }
 0x200   :  { %v222_v30 = vpop.permute.xlu0 %221 }
 0x201   :  { %v224_v31 = vmul.f32 %v603_v29, %v222_v30 }
 0x203   :  { %226 = vrot.lane.b32.xlu1 %v224_v31, %s751_s15 }
 0x275   :  { %v227_v34 = vpop.permute.xlu1 %226 }
 0x276   :  { %v934_v35 = vadd.f32 %v227_v34, %v219_v33 }
 0x278   :  { %604 = vtanh.f32 %v934_v35 }
 0x282   :  { %v605_v39 = vpop.eup %604 }
 0x283   :  { %232 = vrot.lane.b32.xlu0 %v605_v39, %s754_s24 }
 0x287   :  { %251 = vrot.lane.b32.xlu0 %v247_v40, %s751_s15 }
 0x28b   :  { %346 = vrot.lane.b32.xlu0 %v249_v42, %s751_s15 }
 0x2f5   :  { %v233_v43 = vpop.permute.xlu0 %232 }
 0x2f6   :  { %v235_v44 = vmul.f32 %v603_v29, %v233_v43 }
 0x2f8   :  { %237 = vrot.lane.b32.xlu1 %v235_v44, %s751_s15 }
 0x2f9   :  { %v252_v45 = vpop.permute.xlu0 %251 }
 0x2fd   :  { %v347_v62 = vpop.permute.xlu0 %346 }
 0x36a   :  { %v238_v46 = vpop.permute.xlu1 %237 }
 0x36b   :  { %240 = vst.msk [vmem:[#allocation11] sm:$0xff] %vm122_vm2, %v238_v46  ;;  %v254_v47 = vsel %vm122_vm2, %v238_v46, %v252_v45 }
 0x36c   :  { %v255_v48 = vpack.c.bf16 %v254_v47, %v254_v47 }
 0x36e   :  { %564 = vmatmul.mubr.msk.bf16.vlgmr.msra.gmra.mrb[0].mxu1 %vm164_vm3, %v255_v48 }
 0x441   :  { %v332_v50 = vpop.f32.mrb[0].mxu1 }
 0x442   :  { %v333_v51 = vadd.f32 %v519_v49, %v332_v50  ;;  %v565_v52 = vpop.f32.mrb[1].mxu1 }
 0x443   :  { %v335_v53 = vpop.f32.mrb[2].mxu1 }
 0x444   :  { %606 = vtanh.f32 %v333_v51  ;;  %v566_v54 = vpop.f32.mrb[3].mxu1  ;;  %v525_v56 = vmul.f32 -1.442695, %v333_v51 }
 0x446   :  { %608 = vpow2.f32 %v525_v56 }
 0x44e   :  { %v607_v55 = vpop.eup %606 }
 0x44f   :  { %351 = vrot.lane.b32.xlu1 %v607_v55, %s754_s24 }
 0x450   :  { %v609_v57 = vpop.eup %608 }
 0x451   :  { %v341_v58 = vadd.f32 1.0, %v609_v57 }
 0x453   :  { %610 = vrcp.f32 %v341_v58 }
 0x45d   :  { %v611_v59 = vpop.eup %610 }
 0x45e   :  { %v349_v63 = vmul.f32 %v611_v59, %v347_v62 }
 0x4c1   :  { %v352_v60 = vpop.permute.xlu1 %351 }
 0x4c2   :  { %v354_v61 = vmul.f32 %v611_v59, %v352_v60 }
 0x4c4   :  { %356 = vrot.lane.b32.xlu1 %v354_v61, %s751_s15 }
 0x536   :  { %v357_v0 = vpop.permute.xlu1 %356 }
 0x537   :  { %v359_v1 = vadd.f32 %v357_v0, %v349_v63 }
 0x539   :  { %612 = vtanh.f32 %v359_v1 }
 0x543   :  { %v613_v5 = vpop.eup %612 }
 0x544   :  { %362 = vrot.lane.b32.xlu0 %v613_v5, %s754_s24 }
 0x5b6   :  { %v363_v6 = vpop.permute.xlu0 %362 }
 0x5b7   :  { %v365_v7 = vmul.f32 %v611_v59, %v363_v6 }
 0x5b9   :  { %v378_v8 = vpack.c.bf16 %v365_v7, %v365_v7  ;;  %367 = vrot.lane.b32.xlu0 %v365_v7, %s751_s15 }
 0x5bb   :  { %391 = vrot.lane.b32.xlu1 %v378_v8, %s751_s15  ;;  %s670_s15 = scalar_lea.vmem %s465_s22, 256 }
 0x5bc   :  { %p671_p7 = scmp.ne.s32.totalorder %s465_s22, %s670_s15  ;;  %p676_p9 = scmp.lt.s32.totalorder %s670_s15, %s670_s15 }
 0x5bd   :  { %373 = vrot.lane.b32.xlu0 %v359_v1, %s755_s21 }
 0x5be   :  { %p677_p10 = por %p676_p9, %p675_p8 }
 0x5bf   :  { %242 = vrot.lane.b32.xlu1 %v934_v35, %s755_s21 }
 0x5c0   :  { %p678_p11 = pnand %p677_p10, %p671_p7 }
 0x62b   :  { %v368_v9 = vpop.permute.xlu0 %367 }
 0x62c   :  { %371 = vst.msk [vmem:[#allocation11 + $0x8] sm:$0xff] %vm122_vm2, %v368_v9 }
 0x62d   :  { %v392_v10 = vpop.permute.xlu1 %391 }
 0x62e   :  { %572 = vmatmul.mubr.msk.bf16.vlgmr.msra.gmra.mrb[4].mxu0 %vm122_vm2, %v392_v10 }
 0x62f   :  { %v374_v2 = vpop.permute.xlu0 %373 }
 0x630   :  { %377 = vst.msk [vmem:[#allocation13 + $0x8] sm:$0xff] %vm122_vm2, %v374_v2 }
 0x631   :  { %v243_v11 = vpop.permute.xlu1 %242 }
 0x632   :  { %245 = vst.msk [vmem:[#allocation13] sm:$0xff] %vm122_vm2, %v243_v11 }
 0x633   :  { %681 = shalt.err (!%p678_p11)
}
 0x634   :  { %s682_s16 = scalar_lea.hbm %s1035_s11, 256 }
 0x635   :  { %p683_p12 = scmp.ne.s32.totalorder %s1035_s11, %s682_s16  ;;  %p686_p13 = scmp.lt.u32.totalorder %s682_s16, %s1035_s11 }
 0x637   :  { %p688_p0 = pnand %p686_p13, %p683_p12 }
 0x639   :  { %691 = shalt.err (!%p688_p0)
}
 0x63a   :  { %s1039_s24 = smov 128   ;;  %s757_s29 = smov [#allocation13]  }
 0x63b   :  { %470 = dma.vmem_to_hbm [thread:$0]  %s465_s22, 256, %s1035_s11, [#allocation12], %s1039_s24, %s1039_s24, %s749_s18  }
 0x63c   :  { %s476_s25 = sshll.u32 %s757_s29, 4  ;;  %s477_s25 = int_to_ptr.vmem [resolvable:$true] %s476_s25 }
 0x63d   :  { %s692_s26 = scalar_lea.vmem %s477_s25, 256  ;;  %p697_p2 = scmp.lt.s32.totalorder %s477_s25, %s477_s25 }
 0x63e   :  { %p693_p1 = scmp.ne.s32.totalorder %s477_s25, %s692_s26  ;;  %p698_p3 = scmp.lt.s32.totalorder %s692_s26, %s692_s26 }
 0x640   :  { %p699_p4 = por %p698_p3, %p697_p2 }
 0x642   :  { %p700_p5 = pnand %p699_p4, %p693_p1 }
 0x644   :  { %703 = shalt.err (!%p700_p5)
}
 0x645   :  { %s704_s19 = scalar_lea.hbm %s1036_s12, 256 }
 0x646   :  { %p705_p6 = scmp.ne.s32.totalorder %s1036_s12, %s704_s19  ;;  %p708_p7 = scmp.lt.u32.totalorder %s704_s19, %s1036_s12 }
 0x648   :  { %p710_p8 = pnand %p708_p7, %p705_p6 }
 0x64a   :  { %713 = shalt.err (!%p710_p8)
}
 0x64b   :  { %482 = dma.vmem_to_hbm [thread:$0]  %s477_s25, 256, %s1036_s12, [#allocation12], %s1039_s24, %s1039_s24, %s749_s18  }
 0x64c   :  { %v526_v12 = vld [vmem:[%s1033_s9] ss:$0 sm:$0xff]  ;;  %s758_s8 = smov [#allocation10]  }
 0x64d   :  { %s455_s22 = sshll.u32 %s758_s8, 4  ;;  %s456_s22 = int_to_ptr.vmem [resolvable:$true] %s455_s22 }
 0x64e   :  { %s714_s15 = scalar_lea.vmem %s456_s22, 128  ;;  %p719_p10 = scmp.lt.s32.totalorder %s456_s22, %s456_s22 }
 0x64f   :  { %p715_p9 = scmp.ne.s32.totalorder %s456_s22, %s714_s15  ;;  %p720_p11 = scmp.lt.s32.totalorder %s714_s15, %s714_s15 }
 0x651   :  { %p721_p12 = por %p720_p11, %p719_p10 }
 0x653   :  { %p722_p13 = pnand %p721_p12, %p715_p9 }
 0x701   :  { %v442_v13 = vpop.f32.mrb[4].mxu0 }
 0x702   :  { %v443_v14 = vadd.f32 %v526_v12, %v442_v13  ;;  %v573_v15 = vpop.f32.mrb[5].mxu0 }
 0x703   :  { %v445_v16 = vpop.f32.mrb[6].mxu0 }
 0x704   :  { %448 = vst [vmem:[#allocation10] sm:$0xff] %v443_v14  ;;  %v574_v17 = vpop.f32.mrb[7].mxu0 }
 0x705   :  { %725 = shalt.err (!%p722_p13)
}
 0x706   :  { %s726_s9 = scalar_lea.hbm %s1034_s10, 128 }
 0x707   :  { %p727_p0 = scmp.ne.s32.totalorder %s1034_s10, %s726_s9  ;;  %p730_p1 = scmp.lt.u32.totalorder %s726_s9, %s1034_s10 }
 0x709   :  { %p732_p2 = pnand %p730_p1, %p727_p0 }
 0x70b   :  { %735 = shalt.err (!%p732_p2)
}
 0x70c   :  { %458 = dma.vmem_to_hbm [thread:$0]  %s456_s22, 128, %s1034_s10, [#allocation5]  }
 0x70d   :  { %742 = dma.done.wait [#allocation5], 128  }
 0x70e   :  { %743 = vsyncadd [#allocation5], 4294967168 }
 0x70f   :  { %744 = dma.done.wait [#allocation12], 512  }
 0x710   :  { %745 = vsyncadd [#allocation12], 4294966784 }
 0x711   :  { %492 = vsyncpa [#allocation4], 1 }
 0x712   :  { %493 = vsyncpa [#allocation9], 1 }
 0x713   :  { %494 = vsyncpa [#allocation5], 1 }
 0x714   :  { %495 = vsyncpa [#allocation12], 1 }
 0x715   :  { %496 = vsyncpa [#allocation6], 1 }

</bundles_post_ra>
